<compile_context>
chip_gen: v5e
topology: v5e:2x2
jax: 0.10.0
libtpu: 0.0.40
codegen_flags: <defaults>
</compile_context>

<pallas_src>
import jax
import jax.numpy as jnp
from jax.experimental import pallas as pl
from jax.experimental.pallas import tpu as pltpu


def blocknet_kernel(x_ref, wt_ref, dw_ref, db_ref, o_ref):
    """One batch tile of the forward pass.

    x_ref : (TILE_N, C*L)  VMEM  input rows (natural (N, C, L) layout, flattened)
    wt_ref: (C*L, L_out)   VMEM  Toeplitz-expanded conv filter (same block every step)
    dw_ref: (1, L_out)     VMEM  dense weights (row vector)
    db_ref: (1, 1)         SMEM  dense bias
    o_ref : (TILE_N, 1)    VMEM  sigmoid output
    """
    # x could be shipped as bf16 and upcast here to halve HBM reads; kept f32
    # to preserve the module's numerics exactly.
    x = x_ref[...].astype(jnp.float32)                       # (TILE_N, C*L)

    # Conv1d (cross-correlation, no bias) as a single MXU matmul against the
    # Toeplitz weight matrix; full f32 precision on the MXU.
    conv = jnp.dot(x, wt_ref[...],
                   preferred_element_type=jnp.float32,
                   precision=jax.lax.Precision.HIGHEST)      # (TILE_N, L_out)
    conv = jnp.maximum(conv, 0.0)                            # ReLU

    # Dense (L_out -> 1) + bias: broadcast multiply + lane reduce, then sigmoid.
    logits = jnp.sum(conv * dw_ref[...], axis=-1, keepdims=True) + db_ref[0, 0]
    o_ref[...] = jax.nn.sigmoid(logits).astype(o_ref.dtype)  # (TILE_N, 1)


def _batch_tile(n, row_bytes):
    """Pick the batch tile from a VMEM byte budget.

    Targets multi-MiB input DMAs (so the ~0.35 us per-grid-step overhead is
    amortized) while keeping >=4 grid steps when the batch is large enough
    (feeds both v7x TensorCores) and tiles >= ~1 MiB.
    """
    budget = 6 * 1024 * 1024                       # per x block (double-buffered)
    cap = max(8, (budget // row_bytes) // 8 * 8)
    if n <= cap:
        return n                                   # one block; block dim == array dim is legal
    min_tile = max(8, ((1 << 20) // row_bytes) // 8 * 8)
    quarter = max(min_tile, ((-(-n // 4)) + 7) // 8 * 8)
    return min(cap, quarter)


def blocknet_forward(x, conv_w, dense_w, dense_b, filter_size):
    """x: (N, C, L) f32; conv_w: (1, C, F); dense_w: (1, L_out); dense_b: (1,)."""
    n, c, length = x.shape
    l_out = length - (filter_size - 1)
    cl = c * length

    # Toeplitz expansion of the conv filter: W[ch*L + p, j] = w[ch, p - j] when
    # 0 <= p - j < F else 0, so x2d @ W == Conv1d(x).  Tiny (C*L x L_out); in a
    # real deployment it would be precomputed once per weight update.
    cw = conv_w.reshape(c, filter_size).astype(jnp.float32)
    ch_idx = jnp.arange(cl) // length
    pos_idx = jnp.arange(cl) % length
    tap = pos_idx[:, None] - jnp.arange(l_out)[None, :]       # (C*L, L_out)
    valid = (tap >= 0) & (tap < filter_size)
    w_toe = jnp.where(valid,
                      cw[ch_idx[:, None], jnp.clip(tap, 0, filter_size - 1)],
                      0.0).astype(jnp.float32)                # (C*L, L_out)

    dw = dense_w.reshape(1, l_out).astype(jnp.float32)        # (1, L_out)
    db = dense_b.reshape(1, 1).astype(jnp.float32)            # (1, 1)

    # Natural layout: (N, C, L) -> (N, C*L) is a free contiguous reshape —
    # no extra HBM pass over x before the kernel.
    x2d = x.reshape(n, cl).astype(jnp.float32)

    tile_n = _batch_tile(n, cl * 4)
    grid = (pl.cdiv(n, tile_n),)   # ragged last block: OOB reads unused, OOB writes dropped

    out = pl.pallas_call(
        blocknet_kernel,
        out_shape=jax.ShapeDtypeStruct((n, 1), jnp.float32),
        grid=grid,
        in_specs=[
            pl.BlockSpec((tile_n, cl), lambda i: (i, 0)),          # x rows (pipelined)
            pl.BlockSpec((cl, l_out), lambda i: (0, 0)),           # Toeplitz conv weights
            pl.BlockSpec((1, l_out), lambda i: (0, 0)),            # dense weights
            pl.BlockSpec(memory_space=pltpu.MemorySpace.SMEM),     # dense bias
        ],
        out_specs=pl.BlockSpec((tile_n, 1), lambda i: (i, 0)),
        compiler_params=pltpu.CompilerParams(
            dimension_semantics=("parallel",),
            vmem_limit_bytes=48 * 1024 * 1024,
        ),
    )(x2d, w_toe, dw, db)                                          # (N, 1)

    return out


def blocknet_reference(x, conv_w, dense_w, dense_b, filter_size):
    """Pure-JAX reference matching the PyTorch forward (independent of the kernel)."""
    n, c, length = x.shape
    l_out = length - (filter_size - 1)
    cw = conv_w.reshape(c, filter_size)
    acc = jnp.zeros((n, l_out), jnp.float32)
    for ch in range(c):
        for k in range(filter_size):
            acc = acc + x[:, ch, k:k + l_out] * cw[ch, k]
    conv = jnp.maximum(acc, 0.0)
    logits = conv @ dense_w.reshape(l_out, 1) + dense_b.reshape(1, 1)
    return jax.nn.sigmoid(logits)


if __name__ == "__main__":
    key = jax.random.PRNGKey(0)
    kx, kc, kd, kb = jax.random.split(key, 4)

    # Small shapes consistent with the module: Conv1d expects (N, 4, size).
    filter_size = 5
    size = 16
    batch = 2
    l_out = size - (filter_size - 1)          # = 12

    x = jax.random.normal(kx, (batch, 4, size), dtype=jnp.float32)
    conv_w = 0.1 * jax.random.normal(kc, (1, 4, filter_size), dtype=jnp.float32)
    dense_w = 0.1 * jax.random.normal(kd, (1, l_out), dtype=jnp.float32)
    dense_b = 0.1 * jax.random.normal(kb, (1,), dtype=jnp.float32)

    out = blocknet_forward(x, conv_w, dense_w, dense_b, filter_size)
    out = jax.block_until_ready(out)

    ref = blocknet_reference(x, conv_w, dense_w, dense_b, filter_size)
    assert out.shape == (batch, 1), out.shape
    assert jnp.allclose(out, ref, atol=1e-5, rtol=1e-5), (out, ref)

    print("KERNEL_OK")
</pallas_src>

<mosaic_0001>
module attributes {stable_mosaic.version = 11 : i64} {
  func.func @blocknet_kernel(%arg0: i32, %arg1: memref<2x64xf32, #tpu.memory_space<vmem>>, %arg2: memref<64x12xf32, #tpu.memory_space<vmem>>, %arg3: memref<1x12xf32, #tpu.memory_space<vmem>>, %arg4: memref<1x1xf32, #tpu.memory_space<smem>>, %arg5: memref<2x1xf32, #tpu.memory_space<vmem>>) attributes {dimension_semantics = [#tpu.dimension_semantics<parallel>], iteration_bounds = array<i64: 1>, scalar_prefetch = 0 : i64, scratch_operands = 0 : i64, tpu.core_type = #tpu.core_type<tc>, window_params = [{transform_indices = @transform_0, window_bounds = array<i64: 2, 64>}, {pipeline_mode = #tpu.pipeline_mode<synchronous>, transform_indices = @transform_1, window_bounds = array<i64: 64, 12>}, {pipeline_mode = #tpu.pipeline_mode<synchronous>, transform_indices = @transform_2, window_bounds = array<i64: 1, 12>}, {transform_indices = @transform_3, window_bounds = array<i64: 1, 1>}, {transform_indices = @transform_4, window_bounds = array<i64: 2, 1>}]} {
    %c0 = arith.constant 0 : index
    %c0_0 = arith.constant 0 : index
    %0 = vector.load %arg1[%c0, %c0_0] : memref<2x64xf32, #tpu.memory_space<vmem>>, vector<2x64xf32>
    %c0_1 = arith.constant 0 : index
    %c0_2 = arith.constant 0 : index
    %1 = vector.load %arg2[%c0_1, %c0_2] : memref<64x12xf32, #tpu.memory_space<vmem>>, vector<64x12xf32>
    %cst = arith.constant dense<0.000000e+00> : vector<2x12xf32>
    %2 = tpu.matmul %0, %1, %cst {dimension_numbers = #tpu.dot_dimension_numbers<[1], [0], [0], [1], [0, 0, 1, 1], [], []>, precision = #tpu.contract_precision<fp32>} : vector<2x64xf32>, vector<64x12xf32>, vector<2x12xf32> -> vector<2x12xf32>
    %cst_3 = arith.constant 0.000000e+00 : f32
    %3 = vector.broadcast %cst_3 : f32 to vector<2x12xf32>
    %4 = arith.maximumf %2, %3 : vector<2x12xf32>
    %c0_4 = arith.constant 0 : index
    %c0_5 = arith.constant 0 : index
    %5 = vector.load %arg3[%c0_4, %c0_5] : memref<1x12xf32, #tpu.memory_space<vmem>>, vector<1x12xf32>
    %6 = vector.broadcast %5 : vector<1x12xf32> to vector<2x12xf32>
    %7 = arith.mulf %4, %6 : vector<2x12xf32>
    %cst_6 = arith.constant dense<0.000000e+00> : vector<2xf32>
    %8 = vector.multi_reduction <add>, %7, %cst_6 [1] : vector<2x12xf32> to vector<2xf32>
    %9 = vector.shape_cast %8 : vector<2xf32> to vector<2x1xf32>
    %c0_7 = arith.constant 0 : index
    %c0_8 = arith.constant 0 : index
    %10 = memref.load %arg4[%c0_7, %c0_8] : memref<1x1xf32, #tpu.memory_space<smem>>
    %11 = vector.broadcast %10 : f32 to vector<2x1xf32>
    %12 = arith.addf %9, %11 : vector<2x1xf32>
    %13 = arith.negf %12 : vector<2x1xf32>
    %14 = math.exp %13 : vector<2x1xf32>
    %cst_9 = arith.constant 1.000000e+00 : f32
    %15 = vector.broadcast %cst_9 : f32 to vector<2x1xf32>
    %16 = arith.addf %15, %14 : vector<2x1xf32>
    %17 = arith.divf %15, %16 : vector<2x1xf32>
    %c0_10 = arith.constant 0 : index
    %c0_11 = arith.constant 0 : index
    %18 = vector.load %arg5[%c0_10, %c0_11] : memref<2x1xf32, #tpu.memory_space<vmem>>, vector<2x1xf32>
    tpu.vector_store %arg5[%c0_10, %c0_11], %17 {strides = array<i32>} : memref<2x1xf32, #tpu.memory_space<vmem>>, vector<2x1xf32>,
    return
  }
  func.func @transform_0(%arg0: i32) -> (i32, i32) {
    %c0_i32 = arith.constant 0 : i32
    %c0_i32_0 = arith.constant 0 : i32
    return %arg0, %c0_i32 : i32, i32
  }
  func.func @transform_1(%arg0: i32) -> (i32, i32) {
    %c0_i32 = arith.constant 0 : i32
    %c0_i32_0 = arith.constant 0 : i32
    %c0_i32_1 = arith.constant 0 : i32
    return %c0_i32, %c0_i32_0 : i32, i32
  }
  func.func @transform_2(%arg0: i32) -> (i32, i32) {
    %c0_i32 = arith.constant 0 : i32
    %c0_i32_0 = arith.constant 0 : i32
    %c0_i32_1 = arith.constant 0 : i32
    return %c0_i32, %c0_i32_0 : i32, i32
  }
  func.func @transform_3(%arg0: i32) -> (i32, i32) {
    %c0_i32 = arith.constant 0 : i32
    %c0_i32_0 = arith.constant 0 : i32
    %c0_i32_1 = arith.constant 0 : i32
    return %c0_i32, %c0_i32_0 : i32, i32
  }
  func.func @transform_4(%arg0: i32) -> (i32, i32) {
    %c0_i32 = arith.constant 0 : i32
    %c0_i32_0 = arith.constant 0 : i32
    return %arg0, %c0_i32 : i32, i32
  }
}

</mosaic_0001>

<bundles_post_ra>
// kernel: tpu_custom_call.1
= control target key start
LH: loop header
LB: loop body
LE: loop exit
PB: predicated region body
PF: predicated region fallthrough
CT: control target
= control target key end

     0   :  { %vm27_vm0 = vcmask 523264   ;;  %vm274_vm1 = vcmask 91136   ;;  %vm300_vm5 = vcmask 1024   ;;  %s456_s1 = inlined_call_operand.vmem [shape: f32[64,12], index: 1, kind: input, shape index: {}]   ;;  %s457_s0 = inlined_call_operand.vmem [shape: f32[2,64], index: 0, kind: input, shape index: {}]   ;;  %s458_s2 = inlined_call_operand.vmem [shape: f32[1,12], index: 2, kind: input, shape index: {}]   ;;  %s459_s3 = inlined_call_operand.<no memory space> [shape: f32[1,1], index: 3, kind: input, shape index: {}]   ;;  %s460_s4 = inlined_call_operand.vmem [shape: f32[2,1], index: 4, kind: output, shape index: {}]  }
   0x1   :  { %v26_v0 = vld [vmem:[%s456_s1 + $0x38] sm:$0xff]  ;;  %v25_v1 = vld [vmem:[%s456_s1 + $0x30] sm:$0xff]  ;;  %v24_v2 = vld [vmem:[%s456_s1 + $0x28] sm:$0xff] }
   0x2   :  { %v346_v3 = vand.u32 4294901760, %v26_v0  ;;  %v348_v4 = vand.u32 4294901760, %v25_v1  ;;  %v350_v5 = vand.u32 4294901760, %v24_v2  ;;  %v23_v6 = vld [vmem:[%s456_s1 + $0x20] sm:$0xff]  ;;  %v22_v7 = vld [vmem:[%s456_s1 + $0x18] sm:$0xff]  ;;  %v21_v8 = vld [vmem:[%s456_s1 + $0x10] sm:$0xff] }
   0x3   :  { %v361_v9 = vand.u32 4294901760, %v23_v6  ;;  %v363_v10 = vand.u32 4294901760, %v22_v7  ;;  %v365_v11 = vand.u32 4294901760, %v21_v8  ;;  %v20_v12 = vld [vmem:[%s456_s1 + $0x8] sm:$0xff]  ;;  %v19_v13 = vld [vmem:[%s456_s1] sm:$0xff] }
   0x4   :  { %40 = vmatpush.msra.mxu0 %v346_v3  ;;  %v375_v14 = vsub.f32 %v26_v0, %v346_v3  ;;  %v378_v15 = vsub.f32 %v25_v1, %v348_v4  ;;  %172 = vmatpush.msra.mxu3 %v346_v3  ;;  %v382_v16 = vsub.f32 %v24_v2, %v350_v5  ;;  %v384_v17 = vand.u32 4294901760, %v20_v12  ;;  %v18_v32 = vld [vmem:[%s457_s0] sm:$0x3] }
   0x5   :  { %v387_v18 = vsub.f32 %v23_v6, %v361_v9  ;;  %v390_v19 = vsub.f32 %v22_v7, %v363_v10  ;;  %v393_v20 = vsub.f32 %v21_v8, %v365_v11  ;;  %v400_v24 = vand.u32 4294901760, %v19_v13  ;;  %v307_v2 = vld [vmem:[%s458_s2] ss:$0 sm:$0xff] }
   0x6   :  { %42 = vmatpush.msra.mxu0 %v348_v4  ;;  %v74_v21 = vand.u32 4294901760, %v375_v14  ;;  %135 = vmatpush.msra.mxu2 %v375_v14  ;;  %v80_v22 = vand.u32 4294901760, %v378_v15  ;;  %v86_v23 = vand.u32 4294901760, %v382_v16  ;;  %v405_v26 = vsub.f32 %v20_v12, %v384_v17 }
   0x7   :  { %174 = vmatpush.msra.mxu3 %v348_v4  ;;  %v92_v25 = vand.u32 4294901760, %v387_v18  ;;  %v98_v30 = vand.u32 4294901760, %v390_v19  ;;  %v104_v31 = vand.u32 4294901760, %v393_v20  ;;  %v115_v36 = vsub.f32 %v19_v13, %v400_v24 }
   0x8   :  { %44 = vmatpush.msra.mxu0 %v350_v5  ;;  %v75_v27 = vsub.f32 %v375_v14, %v74_v21  ;;  %v81_v28 = vsub.f32 %v378_v15, %v80_v22  ;;  %138 = vmatpush.msra.mxu2 %v378_v15  ;;  %v87_v29 = vsub.f32 %v382_v16, %v86_v23  ;;  %v110_v39 = vand.u32 4294901760, %v405_v26 }
   0x9   :  { %176 = vmatpush.msra.mxu3 %v350_v5  ;;  %v93_v35 = vsub.f32 %v387_v18, %v92_v25  ;;  %v99_v38 = vsub.f32 %v390_v19, %v98_v30  ;;  %v29_v40 = vsel %vm27_vm0, %v18_v32, 0  ;;  %v105_v43 = vsub.f32 %v393_v20, %v104_v31 }
   0xa   :  { %v76_v33 = vand.u32 4294901760, %v75_v27  ;;  %46 = vmatpush.msra.mxu0 %v361_v9  ;;  %v82_v34 = vand.u32 4294901760, %v81_v28  ;;  %141 = vmatpush.msra.mxu2 %v382_v16  ;;  %v88_v37 = vand.u32 4294901760, %v87_v29  ;;  %v55_v41 = vand.u32 4294901760, %v29_v40 }
   0xb   :  { %178 = vmatpush.msra.mxu3 %v361_v9  ;;  %v94_v42 = vand.u32 4294901760, %v93_v35  ;;  %v116_v44 = vand.u32 4294901760, %v115_v36  ;;  %v100_v46 = vand.u32 4294901760, %v99_v38  ;;  %v111_v47 = vsub.f32 %v405_v26, %v110_v39 }
   0xc   :  { %77 = vmatpush.msra.mxu1 %v76_v33  ;;  %48 = vmatpush.msra.mxu0 %v363_v10  ;;  %v56_v45 = vsub.f32 %v29_v40, %v55_v41  ;;  %v106_v49 = vand.u32 4294901760, %v105_v43  ;;  %v279_v6 = vstv %s459_s3 }
   0xd   :  { %144 = vmatpush.msra.mxu2 %v387_v18  ;;  %180 = vmatpush.msra.mxu3 %v363_v10  ;;  %v117_v50 = vsub.f32 %v115_v36, %v116_v44  ;;  %v112_v52 = vand.u32 4294901760, %v111_v47 }
   0xe   :  { %83 = vmatpush.msra.mxu1 %v82_v34  ;;  %50 = vmatpush.msra.mxu0 %v365_v11  ;;  %v57_v48 = vand.u32 4294901760, %v56_v45 }
   0xf   :  { %147 = vmatpush.msra.mxu2 %v390_v19  ;;  %182 = vmatpush.msra.mxu3 %v365_v11  ;;  %v118_v54 = vand.u32 4294901760, %v117_v50 }
  0x10   :  { %89 = vmatpush.msra.mxu1 %v88_v37  ;;  %52 = vmatpush.msra.mxu0 %v384_v17  ;;  %v58_v51 = vsub.f32 %v56_v45, %v57_v48 }
  0x11   :  { %150 = vmatpush.msra.mxu2 %v393_v20  ;;  %184 = vmatpush.msra.mxu3 %v384_v17 }
  0x12   :  { %95 = vmatpush.msra.mxu1 %v94_v42  ;;  %54 = vmatpush.msra.mxu0 %v400_v24  ;;  %v59_v53 = vand.u32 4294901760, %v58_v51 }
  0x13   :  { %153 = vmatpush.msra.mxu2 %v405_v26  ;;  %186 = vmatpush.msra.mxu3 %v400_v24 }
  0x14   :  { %205 = vmatpush.msrb.mxu0 %v74_v21  ;;  %101 = vmatpush.msra.mxu1 %v100_v46 }
  0x15   :  { %156 = vmatpush.msra.mxu2 %v115_v36  ;;  %190 = vmatmul.f32.vlgmr.msra.gmra.mxu3 %v57_v48 }
  0x16   :  { %209 = vmatpush.msrb.mxu0 %v80_v22  ;;  %107 = vmatpush.msra.mxu1 %v106_v49 }
  0x17   :  { %159 = vmatmul.f32.vlgmr.msra.gmra.mxu2 %v56_v45  ;;  %60 = vmatmul.f32.vlgmr.msra.gmra.mxu0 %v59_v53 }
  0x18   :  { %213 = vmatpush.msrb.mxu0 %v86_v23  ;;  %113 = vmatpush.msra.mxu1 %v112_v52 }
  0x1a   :  { %217 = vmatpush.msrb.mxu0 %v92_v25  ;;  %119 = vmatpush.msra.mxu1 %v118_v54 }
  0x1b   :  { %121 = vmatmul.f32.vlgmr.msra.gmra.mxu1 %v55_v41 }
  0x1c   :  { %248 = vmatpush.msrb.mxu1 %v346_v3  ;;  %221 = vmatpush.msrb.mxu0 %v98_v30 }
  0x1e   :  { %250 = vmatpush.msrb.mxu1 %v348_v4  ;;  %225 = vmatpush.msrb.mxu0 %v104_v31 }
  0x20   :  { %252 = vmatpush.msrb.mxu1 %v350_v5  ;;  %229 = vmatpush.msrb.mxu0 %v110_v39 }
  0x22   :  { %254 = vmatpush.msrb.mxu1 %v361_v9  ;;  %233 = vmatpush.msrb.mxu0 %v116_v44 }
  0x23   :  { %235 = vmatmul.f32.vlgmr.msrb.gmra.mxu0 %v55_v41 }
  0x24   :  { %256 = vmatpush.msrb.mxu1 %v363_v10 }
  0x26   :  { %258 = vmatpush.msrb.mxu1 %v365_v11 }
  0x28   :  { %260 = vmatpush.msrb.mxu1 %v384_v17 }
  0x2a   :  { %262 = vmatpush.msrb.mxu1 %v400_v24 }
  0x2b   :  { %264 = vmatmul.f32.vlgmr.msrb.gmra.mxu1 %v55_v41 }
  0x94   :  { %v61_v55 = vpop.f32.mrf.mxu0 }
  0x98   :  { %v122_v56 = vpop.f32.mrf.mxu1  ;;  %v191_v60 = vpop.f32.mrf.mxu3 }
  0x99   :  { %v123_v57 = vadd.f32 %v122_v56, %v61_v55 }
  0x9a   :  { %v160_v58 = vpop.f32.mrf.mxu2 }
  0x9b   :  { %v161_v59 = vadd.f32 %v160_v58, %v123_v57 }
  0x9d   :  { %v192_v61 = vadd.f32 %v191_v60, %v161_v59 }
  0xa0   :  { %v236_v62 = vpop.f32.mrf.mxu0 }
  0xa1   :  { %v237_v63 = vadd.f32 %v236_v62, %v192_v61 }
  0xa8   :  { %v265_v0 = vpop.f32.mrf.mxu1 }
  0xa9   :  { %v266_v1 = vadd.f32 %v265_v0, %v237_v63 }
  0xab   :  { %v268_v3 = vmax.f32 %v266_v1, 0.0 }
  0xad   :  { %v273_v4 = vmul.f32 %v307_v2, %v268_v3 }
  0xaf   :  { %v275_v5 = vsel %vm274_vm1, %v273_v4, 0.0 }
  0xb0   :  { %276 = vadd.xlane.f32.xlu0 %v275_v5 }
 0x123   :  { %v277_v7 = vpop.xlane.xlu0 %276 }
 0x124   :  { %v280_v8 = vadd.f32 %v279_v6, %v277_v7 }
 0x126   :  { %v306_v9 = vmul.f32 -1.442695, %v280_v8 }
 0x128   :  { %308 = vpow2.f32 %v306_v9 }
 0x12e   :  { %v309_v10 = vpop.eup %308 }
 0x12f   :  { %v284_v11 = vadd.f32 1.0, %v309_v10 }
 0x131   :  { %310 = vrcp.f32 %v284_v11  ;;  %v296_v15 = vand.u32 2147483648, %v284_v11  ;;  %v294_v17 = vand.u32 2147483647, %v284_v11  ;;  %vm290_vm3 = vweird.f32 %v284_v11 }
 0x133   :  { %v297_v19 = vor.u32 1.1754944e-38, %v296_v15  ;;  %vm295_vm6 = vcmp.eq.f32.partialorder %v294_v17, 8.507059e+37 }
 0x137   :  { %v311_v12 = vpop.eup %310 }
 0x138   :  { %v286_v13 = vmul.f32 %v311_v12, %v284_v11  ;;  %vm291_vm2 = vweird.f32 %v311_v12 }
 0x139   :  { %vm292_vm4 = vmor %vm290_vm3, %vm291_vm2 }
 0x13a   :  { %v287_v14 = vsub.f32 1.0, %v286_v13 }
 0x13c   :  { %v288_v16 = vmul.f32 %v311_v12, %v287_v14 }
 0x13e   :  { %v289_v18 = vadd.f32 %v311_v12, %v288_v16 }
 0x140   :  { %v293_v20 = vsel %vm292_vm4, %v311_v12, %v289_v18 }
 0x141   :  { %v298_v21 = vsel %vm295_vm6, %v297_v19, %v293_v20 }
 0x142   :  { %301 = vst.msk [vmem:[%s460_s4] sm:$0x3] %vm300_vm5, %v298_v21 }

</bundles_post_ra>
